<compile_context>
chip_gen: v6e
topology: v6e:2x2x1
jax: 0.10.0
libtpu: 0.0.40
codegen_flags: <defaults>
</compile_context>

<pallas_src>
from math import sqrt
from functools import partial

import jax
import jax.numpy as jnp
from jax.experimental import pallas as pl
from jax.experimental.pallas import tpu as pltpu


# ----------------------------------------------------------------------------
# Stage 1: fused Q/K/V projection (Q pre-scaled by 1/sqrt(dim_k))
# ----------------------------------------------------------------------------
def _proj_kernel(x_ref, wq_ref, wk_ref, wv_ref, q_ref, k_ref, v_ref, *, norm_fact):
    # bf16 MXU operands, f32 accumulation.
    x = x_ref[...].astype(jnp.bfloat16)
    wq = wq_ref[...].astype(jnp.bfloat16)
    wk = wk_ref[...].astype(jnp.bfloat16)
    wv = wv_ref[...].astype(jnp.bfloat16)

    q = jnp.dot(x, wq, preferred_element_type=jnp.float32) * norm_fact
    k = jnp.dot(x, wk, preferred_element_type=jnp.float32)
    v = jnp.dot(x, wv, preferred_element_type=jnp.float32)

    q_ref[...] = q.astype(q_ref.dtype)
    k_ref[...] = k.astype(k_ref.dtype)
    v_ref[...] = v.astype(v_ref.dtype)


# ----------------------------------------------------------------------------
# Stage 2: flash attention over the projected (already scaled) Q, K, V
# ----------------------------------------------------------------------------
def _flash_kernel(q_ref, k_ref, v_ref, o_ref, m_scr, l_scr, acc_scr):
    ki = pl.program_id(2)

    @pl.when(ki == 0)
    def _init():
        m_scr[...] = jnp.full(m_scr.shape, -jnp.inf, dtype=jnp.float32)
        l_scr[...] = jnp.zeros(l_scr.shape, dtype=jnp.float32)
        acc_scr[...] = jnp.zeros(acc_scr.shape, dtype=jnp.float32)

    q = q_ref[...]                       # (B, tq, dim_k) bf16, scale folded in
    k = k_ref[...]                       # (B, tk, dim_k) bf16
    v = v_ref[...]                       # (B, tk, dim_v) bf16

    # Scores without materializing K^T (contract last dims of both) -> f32.
    s = jnp.einsum("bqd,bkd->bqk", q, k, preferred_element_type=jnp.float32)

    # Online softmax update (all state kept in f32).
    m_prev = m_scr[...]
    m_new = jnp.maximum(m_prev, jnp.max(s, axis=-1, keepdims=True))
    alpha = jnp.exp(m_prev - m_new)
    p = jnp.exp(s - m_new)
    l_scr[...] = alpha * l_scr[...] + jnp.sum(p, axis=-1, keepdims=True)
    acc_scr[...] = alpha * acc_scr[...] + jnp.einsum(
        "bqk,bkd->bqd", p.astype(v.dtype), v, preferred_element_type=jnp.float32)
    m_scr[...] = m_new

    @pl.when(ki == pl.num_programs(2) - 1)
    def _finalize():
        # EUP reciprocal-multiply normalization (slot otherwise idle here).
        inv = pl.reciprocal(l_scr[...], approx=True)
        o_ref[...] = (acc_scr[...] * inv).astype(o_ref.dtype)


# ----------------------------------------------------------------------------
# VMEM-aware tiling helpers
# ----------------------------------------------------------------------------
def _vmem_capacity_bytes():
    try:
        info = pltpu.get_tpu_info()
        cap = getattr(info, "vmem_capacity_bytes", None)
        if cap:
            return int(cap)
    except Exception:
        pass
    # Conservative default: v7x per-TensorCore VMEM (valid everywhere).
    return 64 * 1024 * 1024


def _proj_vmem_bytes(tm, dim_in, dim_k, dim_v, in_isz, out_isz):
    n_out = 2 * dim_k + dim_v
    return (2 * tm * dim_in * in_isz            # double-buffered x tile
            + 2 * dim_in * n_out * in_isz       # double-buffered weight blocks
            + 2 * tm * n_out * out_isz          # double-buffered output tiles
            + tm * n_out * 4)                   # f32 accumulation transients


def _pick_proj_tile(m_rows, dim_in, dim_k, dim_v, in_isz, out_isz, budget):
    cands = [t for t in (2048, 1024, 512, 256, 128) if m_rows % t == 0] or [m_rows]
    for tm in cands:
        if _proj_vmem_bytes(tm, dim_in, dim_k, dim_v, in_isz, out_isz) <= budget:
            return tm
    return cands[-1]


def _attn_vmem_bytes(b_tile, tq, tk, dim_k, dim_v, in_isz, out_isz):
    tiles = 2 * b_tile * (tq * dim_k + tk * dim_k + tk * dim_v) * in_isz  # q/k/v in
    out = 2 * b_tile * tq * dim_v * out_isz                               # output
    scratch = b_tile * tq * (dim_v + 2) * 4                               # m, l, acc
    transients = 3 * b_tile * tq * tk * 4                                 # s, p (+bf16 p)
    return tiles + out + scratch + transients


def _pick_attn_tiles(batch, n, dim_k, dim_v, in_isz, out_isz, budget):
    # Prefer the largest tq (fewest K/V passes), then the largest tk, then a
    # modest batch pack (<= 2: the s/p transients scale with b_tile*tq*tk).
    # TODO(synk): sequence lengths not divisible by 128/256/512/1024 fall back
    # to a full-extent block; very large prime-ish n would need padding.
    seq_cands = [t for t in (1024, 512, 256, 128) if n % t == 0] or [n]
    bt_cands = [t for t in (2, 1) if batch % t == 0] or [1]
    for tq in seq_cands:
        for tk in seq_cands:
            for bt in bt_cands:
                if _attn_vmem_bytes(bt, tq, tk, dim_k, dim_v, in_isz, out_isz) <= budget:
                    return bt, tq, tk
    return 1, seq_cands[-1], seq_cands[-1]


# ----------------------------------------------------------------------------
# Wrapper
# ----------------------------------------------------------------------------
def self_attention(x, wq_t, wk_t, wv_t, dim_k):
    """x: (batch, n, dim_in); w*_t: (dim_in, dim_k/dim_v) (transposed nn.Linear weights)."""
    batch, n, dim_in = x.shape
    dim_v = wv_t.shape[1]
    norm_fact = 1.0 / sqrt(dim_k)

    vmem_cap = _vmem_capacity_bytes()
    vmem_limit = int(vmem_cap * 0.75)          # ~96 MiB on v5e/v6e, ~48 MiB on v7x
    tile_budget = int(vmem_limit * 0.8)

    proj_dtype = jnp.bfloat16                  # MXU-native operands for stage 2
    proj_isz = 2
    x_isz = x.dtype.itemsize
    out_isz = x.dtype.itemsize

    # -------- Stage 1: project x -> scaled Q, K, V (once, not per q tile) ----
    m_rows = batch * n
    x2d = x.reshape(m_rows, dim_in)
    tm = _pick_proj_tile(m_rows, dim_in, dim_k, dim_v, x_isz, proj_isz, tile_budget)

    q2d, k2d, v2d = pl.pallas_call(
        partial(_proj_kernel, norm_fact=norm_fact),
        out_shape=(
            jax.ShapeDtypeStruct((m_rows, dim_k), proj_dtype),
            jax.ShapeDtypeStruct((m_rows, dim_k), proj_dtype),
            jax.ShapeDtypeStruct((m_rows, dim_v), proj_dtype),
        ),
        grid_spec=pltpu.PrefetchScalarGridSpec(
            num_scalar_prefetch=0,
            grid=(m_rows // tm,),
            in_specs=[
                pl.BlockSpec((tm, dim_in), lambda i: (i, 0)),
                pl.BlockSpec((dim_in, dim_k), lambda i: (0, 0)),
                pl.BlockSpec((dim_in, dim_k), lambda i: (0, 0)),
                pl.BlockSpec((dim_in, dim_v), lambda i: (0, 0)),
            ],
            out_specs=(
                pl.BlockSpec((tm, dim_k), lambda i: (i, 0)),
                pl.BlockSpec((tm, dim_k), lambda i: (i, 0)),
                pl.BlockSpec((tm, dim_v), lambda i: (i, 0)),
            ),
        ),
        compiler_params=pltpu.CompilerParams(
            dimension_semantics=("parallel",),
            vmem_limit_bytes=vmem_limit,
        ),
    )(x2d, wq_t, wk_t, wv_t)

    q = q2d.reshape(batch, n, dim_k)
    k = k2d.reshape(batch, n, dim_k)
    v = v2d.reshape(batch, n, dim_v)

    # -------- Stage 2: flash attention over projected Q/K/V ------------------
    b_tile, tq, tk = _pick_attn_tiles(batch, n, dim_k, dim_v, proj_isz, out_isz,
                                      tile_budget)
    grid = (batch // b_tile, n // tq, n // tk)

    return pl.pallas_call(
        _flash_kernel,
        out_shape=jax.ShapeDtypeStruct((batch, n, dim_v), x.dtype),
        grid_spec=pltpu.PrefetchScalarGridSpec(
            num_scalar_prefetch=0,
            grid=grid,
            in_specs=[
                pl.BlockSpec((b_tile, tq, dim_k), lambda b, qi, ki: (b, qi, 0)),
                pl.BlockSpec((b_tile, tk, dim_k), lambda b, qi, ki: (b, ki, 0)),
                pl.BlockSpec((b_tile, tk, dim_v), lambda b, qi, ki: (b, ki, 0)),
            ],
            out_specs=pl.BlockSpec((b_tile, tq, dim_v), lambda b, qi, ki: (b, qi, 0)),
            scratch_shapes=[
                pltpu.VMEM((b_tile, tq, 1), jnp.float32),       # running max m
                pltpu.VMEM((b_tile, tq, 1), jnp.float32),       # running sum l
                pltpu.VMEM((b_tile, tq, dim_v), jnp.float32),   # output accumulator
            ],
        ),
        compiler_params=pltpu.CompilerParams(
            dimension_semantics=("parallel", "parallel", "arbitrary"),
            vmem_limit_bytes=vmem_limit,
        ),
    )(q, k, v)


def self_attention_ref(x, wq_t, wk_t, wv_t, dim_k):
    """Plain-JAX reference mirroring the PyTorch forward."""
    q = x @ wq_t
    k = x @ wk_t
    v = x @ wv_t
    dist = jnp.einsum("bnd,bmd->bnm", q, k) / sqrt(dim_k)
    dist = jax.nn.softmax(dist, axis=-1)
    return jnp.einsum("bnm,bmd->bnd", dist, v)


if __name__ == "__main__":
    # Small shapes consistent with the module: batch=2, n=8, dim_in=32, dim_k=dim_v=16.
    batch, n, dim_in, dim_k, dim_v = 2, 8, 32, 16, 16

    key = jax.random.PRNGKey(0)
    kx, kq, kk, kv_key = jax.random.split(key, 4)

    x = jax.random.normal(kx, (batch, n, dim_in), dtype=jnp.float32)
    # nn.Linear-like weights stored already transposed: (dim_in, dim_out).
    wq_t = jax.random.normal(kq, (dim_in, dim_k), dtype=jnp.float32) / sqrt(dim_in)
    wk_t = jax.random.normal(kk, (dim_in, dim_k), dtype=jnp.float32) / sqrt(dim_in)
    wv_t = jax.random.normal(kv_key, (dim_in, dim_v), dtype=jnp.float32) / sqrt(dim_in)

    out = self_attention(x, wq_t, wk_t, wv_t, dim_k)
    out = jax.block_until_ready(out)

    ref = self_attention_ref(x, wq_t, wk_t, wv_t, dim_k)
    assert out.shape == (batch, n, dim_v)
    # bf16 MXU operands + approx reciprocal => looser tolerance than pure f32.
    assert jnp.allclose(out, ref, atol=3e-2, rtol=3e-2), "mismatch vs reference"

    print("KERNEL_OK")
</pallas_src>

<mosaic_0001>
module attributes {stable_mosaic.version = 11 : i64} {
  func.func @_proj_kernel(%arg0: i32, %arg1: memref<16x32xf32, #tpu.memory_space<vmem>>, %arg2: memref<32x16xf32, #tpu.memory_space<vmem>>, %arg3: memref<32x16xf32, #tpu.memory_space<vmem>>, %arg4: memref<32x16xf32, #tpu.memory_space<vmem>>, %arg5: memref<16x16xbf16, #tpu.memory_space<vmem>>, %arg6: memref<16x16xbf16, #tpu.memory_space<vmem>>, %arg7: memref<16x16xbf16, #tpu.memory_space<vmem>>) attributes {dimension_semantics = [#tpu.dimension_semantics<parallel>], iteration_bounds = array<i64: 1>, scalar_prefetch = 0 : i64, scratch_operands = 0 : i64, tpu.core_type = #tpu.core_type<tc>, window_params = [{transform_indices = @transform_0, window_bounds = array<i64: 16, 32>}, {pipeline_mode = #tpu.pipeline_mode<synchronous>, transform_indices = @transform_1, window_bounds = array<i64: 32, 16>}, {pipeline_mode = #tpu.pipeline_mode<synchronous>, transform_indices = @transform_2, window_bounds = array<i64: 32, 16>}, {pipeline_mode = #tpu.pipeline_mode<synchronous>, transform_indices = @transform_3, window_bounds = array<i64: 32, 16>}, {transform_indices = @transform_4, window_bounds = array<i64: 16, 16>}, {transform_indices = @transform_5, window_bounds = array<i64: 16, 16>}, {transform_indices = @transform_6, window_bounds = array<i64: 16, 16>}]} {
    %c0 = arith.constant 0 : index
    %c0_0 = arith.constant 0 : index
    %0 = vector.load %arg1[%c0, %c0_0] : memref<16x32xf32, #tpu.memory_space<vmem>>, vector<16x32xf32>
    %1 = arith.truncf %0 : vector<16x32xf32> to vector<16x32xbf16>
    %c0_1 = arith.constant 0 : index
    %c0_2 = arith.constant 0 : index
    %2 = vector.load %arg2[%c0_1, %c0_2] : memref<32x16xf32, #tpu.memory_space<vmem>>, vector<32x16xf32>
    %3 = arith.truncf %2 : vector<32x16xf32> to vector<32x16xbf16>
    %c0_3 = arith.constant 0 : index
    %c0_4 = arith.constant 0 : index
    %4 = vector.load %arg3[%c0_3, %c0_4] : memref<32x16xf32, #tpu.memory_space<vmem>>, vector<32x16xf32>
    %5 = arith.truncf %4 : vector<32x16xf32> to vector<32x16xbf16>
    %c0_5 = arith.constant 0 : index
    %c0_6 = arith.constant 0 : index
    %6 = vector.load %arg4[%c0_5, %c0_6] : memref<32x16xf32, #tpu.memory_space<vmem>>, vector<32x16xf32>
    %7 = arith.truncf %6 : vector<32x16xf32> to vector<32x16xbf16>
    %cst = arith.constant dense<0.000000e+00> : vector<16x16xf32>
    %8 = tpu.matmul %1, %3, %cst {dimension_numbers = #tpu.dot_dimension_numbers<[1], [0], [0], [1], [0, 0, 1, 1], [], []>} : vector<16x32xbf16>, vector<32x16xbf16>, vector<16x16xf32> -> vector<16x16xf32>
    %cst_7 = arith.constant 2.500000e-01 : f32
    %9 = vector.broadcast %cst_7 : f32 to vector<16x16xf32>
    %10 = arith.mulf %8, %9 : vector<16x16xf32>
    %cst_8 = arith.constant dense<0.000000e+00> : vector<16x16xf32>
    %11 = tpu.matmul %1, %5, %cst_8 {dimension_numbers = #tpu.dot_dimension_numbers<[1], [0], [0], [1], [0, 0, 1, 1], [], []>} : vector<16x32xbf16>, vector<32x16xbf16>, vector<16x16xf32> -> vector<16x16xf32>
    %cst_9 = arith.constant dense<0.000000e+00> : vector<16x16xf32>
    %12 = tpu.matmul %1, %7, %cst_9 {dimension_numbers = #tpu.dot_dimension_numbers<[1], [0], [0], [1], [0, 0, 1, 1], [], []>} : vector<16x32xbf16>, vector<32x16xbf16>, vector<16x16xf32> -> vector<16x16xf32>
    %13 = arith.truncf %10 : vector<16x16xf32> to vector<16x16xbf16>
    %c0_10 = arith.constant 0 : index
    %c0_11 = arith.constant 0 : index
    %14 = vector.load %arg5[%c0_10, %c0_11] : memref<16x16xbf16, #tpu.memory_space<vmem>>, vector<16x16xbf16>
    tpu.vector_store %arg5[%c0_10, %c0_11], %13 {strides = array<i32>} : memref<16x16xbf16, #tpu.memory_space<vmem>>, vector<16x16xbf16>,
    %15 = arith.truncf %11 : vector<16x16xf32> to vector<16x16xbf16>
    %c0_12 = arith.constant 0 : index
    %c0_13 = arith.constant 0 : index
    %16 = vector.load %arg6[%c0_12, %c0_13] : memref<16x16xbf16, #tpu.memory_space<vmem>>, vector<16x16xbf16>
    tpu.vector_store %arg6[%c0_12, %c0_13], %15 {strides = array<i32>} : memref<16x16xbf16, #tpu.memory_space<vmem>>, vector<16x16xbf16>,
    %17 = arith.truncf %12 : vector<16x16xf32> to vector<16x16xbf16>
    %c0_14 = arith.constant 0 : index
    %c0_15 = arith.constant 0 : index
    %18 = vector.load %arg7[%c0_14, %c0_15] : memref<16x16xbf16, #tpu.memory_space<vmem>>, vector<16x16xbf16>
    tpu.vector_store %arg7[%c0_14, %c0_15], %17 {strides = array<i32>} : memref<16x16xbf16, #tpu.memory_space<vmem>>, vector<16x16xbf16>,
    return
  }
  func.func @transform_0(%arg0: i32) -> (i32, i32) {
    %c0_i32 = arith.constant 0 : i32
    %c0_i32_0 = arith.constant 0 : i32
    return %arg0, %c0_i32 : i32, i32
  }
  func.func @transform_1(%arg0: i32) -> (i32, i32) {
    %c0_i32 = arith.constant 0 : i32
    %c0_i32_0 = arith.constant 0 : i32
    %c0_i32_1 = arith.constant 0 : i32
    return %c0_i32, %c0_i32_0 : i32, i32
  }
  func.func @transform_2(%arg0: i32) -> (i32, i32) {
    %c0_i32 = arith.constant 0 : i32
    %c0_i32_0 = arith.constant 0 : i32
    %c0_i32_1 = arith.constant 0 : i32
    return %c0_i32, %c0_i32_0 : i32, i32
  }
  func.func @transform_3(%arg0: i32) -> (i32, i32) {
    %c0_i32 = arith.constant 0 : i32
    %c0_i32_0 = arith.constant 0 : i32
    %c0_i32_1 = arith.constant 0 : i32
    return %c0_i32, %c0_i32_0 : i32, i32
  }
  func.func @transform_4(%arg0: i32) -> (i32, i32) {
    %c0_i32 = arith.constant 0 : i32
    %c0_i32_0 = arith.constant 0 : i32
    return %arg0, %c0_i32 : i32, i32
  }
  func.func @transform_5(%arg0: i32) -> (i32, i32) {
    %c0_i32 = arith.constant 0 : i32
    %c0_i32_0 = arith.constant 0 : i32
    return %arg0, %c0_i32 : i32, i32
  }
  func.func @transform_6(%arg0: i32) -> (i32, i32) {
    %c0_i32 = arith.constant 0 : i32
    %c0_i32_0 = arith.constant 0 : i32
    return %arg0, %c0_i32 : i32, i32
  }
}

</mosaic_0001>

<bundles_post_ra>
// kernel: tpu_custom_call.1
= control target key start
LH: loop header
LB: loop body
LE: loop exit
PB: predicated region body
PF: predicated region fallthrough
CT: control target
= control target key end

     0   :  { %12 = vsyncpa [#allocation3], 0  ;;  %v370_v3 = vmov 0.0   ;;  %vm371_vm0 = vmmov 0   ;;  %s472_s0 = inlined_call_operand.vmem [shape: f32[16,32], index: 0, kind: input, shape index: {}]   ;;  %s473_s1 = inlined_call_operand.vmem [shape: f32[32,16], index: 1, kind: input, shape index: {}]   ;;  %s474_s2 = inlined_call_operand.vmem [shape: f32[32,16], index: 2, kind: input, shape index: {}]   ;;  %s475_s3 = inlined_call_operand.vmem [shape: f32[32,16], index: 3, kind: input, shape index: {}]   ;;  %s476_s4 = inlined_call_operand.hbm [shape: bf16[16,16], index: 4, kind: output, shape index: {0}]   ;;  %s477_s5 = inlined_call_operand.hbm [shape: bf16[16,16], index: 5, kind: output, shape index: {1}]   ;;  %s478_s6 = inlined_call_operand.hbm [shape: bf16[16,16], index: 6, kind: output, shape index: {2}]  }
   0x1   :  { %v28_v0 = vld [vmem:[%s473_s1 + $0x10] sm:$0xff]  ;;  %v29_v1 = vld [vmem:[%s473_s1 + $0x18] sm:$0xff]  ;;  %275 = vmatprep.subr.bf16.mxu0 %v370_v3  ;;  %283 = vmatprep.subr.bf16.mxu1 %v370_v3  ;;  %v26_v6 = vld [vmem:[%s473_s1] sm:$0xff] }
   0x2   :  { %v34_v2 = vld [vmem:[%s474_s2 + $0x10] sm:$0xff]  ;;  %v31_v4 = vpack.c.bf16 %v29_v1, %v28_v0  ;;  %v35_v5 = vld [vmem:[%s474_s2 + $0x18] sm:$0xff]  ;;  %v27_v7 = vld [vmem:[%s473_s1 + $0x8] sm:$0xff]  ;;  %279 = vmatprep.mubr.msk.bf16.mxu0 %vm371_vm0, %v370_v3  ;;  %287 = vmatprep.mubr.msk.bf16.mxu1 %vm371_vm0, %v370_v3 }
   0x3   :  { %v37_v8 = vpack.c.bf16 %v35_v5, %v34_v2  ;;  %v32_v9 = vld [vmem:[%s474_s2] sm:$0xff]  ;;  %v33_v10 = vld [vmem:[%s474_s2 + $0x8] sm:$0xff]  ;;  %v30_v11 = vpack.c.bf16 %v27_v7, %v26_v6  ;;  %v40_v15 = vld [vmem:[%s475_s3 + $0x10] sm:$0xff] }
   0x4   :  { %276 = vmatpush3.bf16.msra.mxu0 %v31_v4  ;;  %v23_v12 = vld [vmem:[%s472_s0] sm:$0xff]  ;;  %v24_v13 = vld [vmem:[%s472_s0 + $0x8] sm:$0xff]  ;;  %v36_v14 = vpack.c.bf16 %v33_v10, %v32_v9  ;;  %v41_v16 = vld [vmem:[%s475_s3 + $0x18] sm:$0xff] }
   0x5   :  { %284 = vmatpush3.bf16.msra.mxu1 %v37_v8  ;;  %277 = vmatprep.subr.bf16.mxu0 %v370_v3 }
   0x6   :  { %13 = vsyncpa [#allocation5], 0  ;;  %285 = vmatprep.subr.bf16.mxu1 %v370_v3  ;;  %v25_v17 = vpack.c.bf16 %v24_v13, %v23_v12  ;;  %vm44_vm1 = vcmask 261120   ;;  %v43_v18 = vpack.c.bf16 %v41_v16, %v40_v15  ;;  %v38_v19 = vld [vmem:[%s475_s3] sm:$0xff]  ;;  %v39_v20 = vld [vmem:[%s475_s3 + $0x8] sm:$0xff]  ;;  %vm181_vm2 = vcmask 125952  }
   0x7   :  { %v42_v21 = vpack.c.bf16 %v39_v20, %v38_v19  ;;  %s372_s22 = smov [#allocation4]   ;;  %s373_s3 = smov [#allocation2]  }
   0x8   :  { %278 = vmatpush3.bf16.msra.mxu0 %v30_v11  ;;  %s221_s23 = sshll.u32 %s372_s22, 4  ;;  %s209_s24 = sshll.u32 %s373_s3, 4  ;;  %s222_s23 = int_to_ptr.vmem [resolvable:$true] %s221_s23  ;;  %s210_s24 = int_to_ptr.vmem [resolvable:$true] %s209_s24 }
   0x9   :  { %286 = vmatpush3.bf16.msra.mxu1 %v36_v14  ;;  %291 = vmatprep.subr.bf16.mxu0 %v370_v3  ;;  %s374_s25 = smov [#allocation6]   ;;  %s306_s27 = scalar_lea.vmem %s222_s23, 128 }
   0xa   :  { %s233_s26 = sshll.u32 %s374_s25, 4  ;;  %p307_p0 = scmp.ne.s32.totalorder %s222_s23, %s306_s27  ;;  %s234_s26 = int_to_ptr.vmem [resolvable:$true] %s233_s26 }
   0xb   :  { %280 = vmatmul.mubr.msk.bf16.vlgmr.msra.gmra.mxu0 %vm44_vm1, %v25_v17  ;;  %p311_p1 = scmp.lt.s32.totalorder %s222_s23, %s222_s23  ;;  %p312_p2 = scmp.lt.s32.totalorder %s306_s27, %s306_s27 }
   0xc   :  { %292 = vmatpush3.bf16.msra.mxu0 %v43_v18  ;;  %288 = vmatmul.mubr.msk.bf16.vlgmr.msra.gmra.mxu1 %vm44_vm1, %v25_v17 }
   0xd   :  { %293 = vmatprep.subr.bf16.mxu0 %v370_v3  ;;  %295 = vmatprep.mubr.msk.bf16.mxu0 %vm371_vm0, %v370_v3  ;;  %p313_p3 = por %p312_p2, %p311_p1 }
   0xf   :  { %p314_p4 = pnand %p313_p3, %p307_p0 }
  0x10   :  { %294 = vmatpush3.bf16.msra.mxu0 %v42_v21 }
  0x13   :  { %296 = vmatmul.mubr.msk.bf16.vlgmr.msra.gmra.mxu0 %vm44_vm1, %v25_v17 }
  0xcb   :  { %v82_v22 = vpop.f32.mrf.mxu0 }
  0xcc   :  { %v89_v23 = vmul.f32 0.25, %v82_v22  ;;  %v125_v24 = vpop.f32.mrf.mxu1 }
  0xcd   :  { %v281_v25 = vpop.f32.mrf.mxu0  ;;  %v262_v26 = vpack.c.bf16 %v125_v24, %v125_v24 }
  0xce   :  { %v260_v27 = vpack.c.bf16 %v89_v23, %v89_v23  ;;  %v289_v28 = vpop.f32.mrf.mxu1 }
  0xcf   :  { %192 = vst.msk [vmem:[#allocation4] sm:$0xf] %vm181_vm2, %v262_v26  ;;  %v85_v29 = vpop.f32.mrf.mxu0 }
  0xd0   :  { %182 = vst.msk [vmem:[#allocation2] sm:$0xf] %vm181_vm2, %v260_v27  ;;  %v90_v30 = vmul.f32 0.25, %v85_v29  ;;  %v128_v31 = vpop.f32.mrf.mxu1 }
  0xd1   :  { %v282_v32 = vpop.f32.mrf.mxu0  ;;  %v263_v33 = vpack.c.bf16 %v128_v31, %v128_v31 }
  0xd2   :  { %v261_v34 = vpack.c.bf16 %v90_v30, %v90_v30  ;;  %v290_v35 = vpop.f32.mrf.mxu1 }
  0xd3   :  { %193 = vst.msk [vmem:[#allocation4 + $0x4] sm:$0xf] %vm181_vm2, %v263_v33  ;;  %v166_v36 = vpop.f32.mrf.mxu0 }
  0xd4   :  { %183 = vst.msk [vmem:[#allocation2 + $0x4] sm:$0xf] %vm181_vm2, %v261_v34  ;;  %v264_v37 = vpack.c.bf16 %v166_v36, %v166_v36 }
  0xd5   :  { %317 = shalt.err (!%p314_p4)
}
  0xd6   :  { %s375_s28 = smov 64   ;;  %s376_s29 = smov 4   ;;  %v297_v38 = vpop.f32.mrf.mxu0 }
  0xd7   :  { %227 = dma.vmem_to_hbm [thread:$0]  %s222_s23, 128, %s477_s5, [#allocation5], %s375_s28, %s375_s28, %s376_s29  }
  0xd8   :  { %s326_s8 = scalar_lea.vmem %s210_s24, 128  ;;  %p331_p6 = scmp.lt.s32.totalorder %s210_s24, %s210_s24 }
  0xd9   :  { %p327_p5 = scmp.ne.s32.totalorder %s210_s24, %s326_s8  ;;  %p332_p7 = scmp.lt.s32.totalorder %s326_s8, %s326_s8 }
  0xdb   :  { %p333_p8 = por %p332_p7, %p331_p6 }
  0xdd   :  { %p334_p9 = pnand %p333_p8, %p327_p5 }
  0xdf   :  { %337 = shalt.err (!%p334_p9)
}
  0xe0   :  { %215 = dma.vmem_to_hbm [thread:$0]  %s210_s24, 128, %s476_s4, [#allocation3], %s375_s28, %s375_s28, %s376_s29   ;;  %202 = vst.msk [vmem:[#allocation6] sm:$0xf] %vm181_vm2, %v264_v37  ;;  %v169_v39 = vpop.f32.mrf.mxu0 }
  0xe1   :  { %v265_v40 = vpack.c.bf16 %v169_v39, %v169_v39  ;;  %s346_s5 = scalar_lea.vmem %s234_s26, 128  ;;  %p351_p11 = scmp.lt.s32.totalorder %s234_s26, %s234_s26 }
  0xe2   :  { %v298_v41 = vpop.f32.mrf.mxu0  ;;  %p347_p10 = scmp.ne.s32.totalorder %s234_s26, %s346_s5  ;;  %p352_p12 = scmp.lt.s32.totalorder %s346_s5, %s346_s5 }
  0xe3   :  { %203 = vst.msk [vmem:[#allocation6 + $0x4] sm:$0xf] %vm181_vm2, %v265_v40 }
  0xe4   :  { %p353_p13 = por %p352_p12, %p351_p11 }
  0xe6   :  { %p354_p0 = pnand %p353_p13, %p347_p10 }
  0xe8   :  { %357 = shalt.err (!%p354_p0)
}
  0xe9   :  { %239 = dma.vmem_to_hbm [thread:$0]  %s234_s26, 128, %s478_s6, [#allocation5], %s375_s28, %s375_s28, %s376_s29  }
  0xea   :  { %366 = dma.done.wait [#allocation3], 128  }
  0xeb   :  { %367 = vsyncadd [#allocation3], 4294967168 }
  0xec   :  { %368 = dma.done.wait [#allocation5], 256  }
  0xed   :  { %369 = vsyncadd [#allocation5], 4294967040 }
  0xee   :  { %249 = vsyncpa [#allocation3], 1 }
  0xef   :  { %250 = vsyncpa [#allocation5], 1 }

</bundles_post_ra>
